<compile_context>
chip_gen: v7x
topology: tpu7x:2x2x1
jax: 0.10.0
libtpu: 0.0.40
codegen_flags: <defaults>
</compile_context>

<pallas_src>
import numpy as np
import jax
import jax.numpy as jnp
from jax.experimental import pallas as pl
from jax.experimental.pallas import tpu as pltpu
from typing import NamedTuple


def _round_up(n, m):
    return ((n + m - 1) // m) * m


def _vmem_limit_bytes():
    """min(96 MiB, 3/4 of physical VMEM): 96 MiB on v5e/v6e, 48 MiB on v7x."""
    cap = 128 * 1024 * 1024
    try:
        info = pltpu.get_tpu_info()
        cap = int(getattr(info, "vmem_capacity_bytes", cap))
    except Exception:
        pass
    return min(96 * 1024 * 1024, (cap * 3) // 4)


# --------------------------------------------------------------------------- #
# Kernel body
# --------------------------------------------------------------------------- #
def _make_vlm_kernel(with_feats):
    """Build the kernel body; `with_feats` statically selects the extra output."""

    def kernel(scale_ref, x_ref, wf_ref, wz_ref, *refs):
        if with_feats:
            logits_ref, feats_ref, acc_ref = refs
        else:
            (logits_ref, acc_ref) = refs
            feats_ref = None

        k = pl.program_id(1)

        # --- init accumulator on first F-tile -------------------------------
        @pl.when(k == 0)
        def _init():
            acc_ref[...] = jnp.zeros_like(acc_ref)

        # --- featurizer projection: accumulate partial x @ w_feat (MXU) -----
        # x may arrive as f32; the VPU cast is free filler under MXU/DMA.
        acc_ref[...] += jnp.dot(
            x_ref[...].astype(jnp.bfloat16),
            wf_ref[...],
            preferred_element_type=jnp.float32,
        )

        # --- finalize on last F-tile: L2 norm + fused bf16 classifier -------
        @pl.when(k == pl.num_programs(1) - 1)
        def _finalize():
            feats = acc_ref[...]
            inv_norm = jax.lax.rsqrt(
                jnp.sum(feats * feats, axis=-1, keepdims=True) + 1e-12
            )
            feats_n = feats * inv_norm
            if with_feats:
                feats_ref[...] = feats_n.astype(feats_ref.dtype)

            # Fold exp(logit_scale) into the (smaller) feats tile, then cast to
            # bf16 so the classifier matmul is a native bf16 MXU op.
            scale = jnp.exp(scale_ref[0])
            feats_s = (feats_n * scale).astype(jnp.bfloat16)
            logits_ref[...] = jnp.dot(
                feats_s, wz_ref[...], preferred_element_type=jnp.float32
            ).astype(logits_ref.dtype)

    return kernel


# --------------------------------------------------------------------------- #
# One-time parameter preparation (hoisted out of the per-call path)
# --------------------------------------------------------------------------- #
class VLMParams(NamedTuple):
    wf_p: jax.Array      # [F_pad, D_pad] bf16 featurizer projection
    wz_p: jax.Array      # [D_pad, NC_pad] bf16 zero-shot text embeddings
    scale: jax.Array     # [1] f32, log logit scale
    F: int
    D: int
    NC: int
    tf: int              # F-reduction tile (divides F_pad)


def prepare_zero_shot_vlm(w_feat, w_zs, logit_scale, *, tf=None):
    """Pad / cast the static parameters once; reuse the result every forward."""
    F, D = w_feat.shape
    _, NC = w_zs.shape

    if tf is None:
        tf = min(2048, _round_up(F, 256))      # big F tiles -> few grid steps
    else:
        tf = _round_up(tf, 256)

    F_pad = _round_up(F, tf)
    D_pad = _round_up(D, 128)                  # lane-dense embedding dim
    NC_pad = _round_up(NC, 128)                # lane-dense class dim

    wf_p = jnp.zeros((F_pad, D_pad), jnp.bfloat16).at[:F, :D].set(
        w_feat.astype(jnp.bfloat16))
    wz_p = jnp.zeros((D_pad, NC_pad), jnp.bfloat16).at[:D, :NC].set(
        w_zs.astype(jnp.bfloat16))
    scale_arr = jnp.asarray([logit_scale], dtype=jnp.float32)

    # TODO(synk): if D_pad * NC_pad * 2 grows past ~12 MiB (huge class counts),
    # the classifier slab should be tiled over NC instead of held VMEM-resident
    # (matters on v7x's 64 MiB VMEM).
    return VLMParams(wf_p, wz_p, scale_arr, F, D, NC, tf)


# --------------------------------------------------------------------------- #
# Forward
# --------------------------------------------------------------------------- #
def zero_shot_vlm_apply(params, x_nchw, return_features=False, *, tb=None):
    """x_nchw: [B, C, H, W].  params: output of prepare_zero_shot_vlm."""
    B = x_nchw.shape[0]
    F_in = int(np.prod(x_nchw.shape[1:]))
    assert F_in == params.F, "input feature size does not match prepared params"

    F_pad, D_pad = params.wf_p.shape
    _, NC_pad = params.wz_p.shape
    tf = params.tf
    NC, D = params.NC, params.D

    # Large batch tiles so w_feat is re-streamed from HBM as few times as
    # possible (its index_map ignores the batch axis).
    if tb is None:
        tb = min(512, _round_up(B, 8))
    else:
        tb = _round_up(min(tb, 512), 8)
    B_pad = _round_up(B, tb)

    x_flat = x_nchw.reshape(B, F_in)
    if B_pad == B and F_pad == F_in:
        x_in = x_flat                           # stream f32 as-is, cast in-kernel
    else:
        # Single fused pad + bf16 cast (one pass over x).
        x_in = jnp.zeros((B_pad, F_pad), jnp.bfloat16).at[:B, :F_in].set(
            x_flat.astype(jnp.bfloat16))

    grid = (B_pad // tb, F_pad // tf)
    vmem_limit = _vmem_limit_bytes()

    logits_spec = pl.BlockSpec((tb, NC_pad), lambda i, k: (i, 0))
    feats_spec = pl.BlockSpec((tb, D_pad), lambda i, k: (i, 0))

    if return_features:
        out_shape = (
            jax.ShapeDtypeStruct((B_pad, NC_pad), jnp.float32),
            jax.ShapeDtypeStruct((B_pad, D_pad), jnp.float32),
        )
        out_specs = (logits_spec, feats_spec)
    else:
        out_shape = jax.ShapeDtypeStruct((B_pad, NC_pad), jnp.float32)
        out_specs = logits_spec

    def build_call(single_buffer_wz):
        wz_kwargs = {}
        if single_buffer_wz:
            # Constant index_map -> never re-fetched; don't double-buffer it.
            wz_kwargs["pipeline_mode"] = pl.Buffered(1)
        in_specs = [
            pl.BlockSpec(memory_space=pltpu.MemorySpace.SMEM),       # logit_scale
            pl.BlockSpec((tb, tf), lambda i, k: (i, k)),             # x tile
            pl.BlockSpec((tf, D_pad), lambda i, k: (k, 0)),          # w_feat tile
            pl.BlockSpec((D_pad, NC_pad), lambda i, k: (0, 0),       # w_zs resident
                         **wz_kwargs),
        ]
        return pl.pallas_call(
            _make_vlm_kernel(return_features),
            out_shape=out_shape,
            grid=grid,
            in_specs=in_specs,
            out_specs=out_specs,
            scratch_shapes=[pltpu.VMEM((tb, D_pad), jnp.float32)],   # feats acc
            compiler_params=pltpu.CompilerParams(
                dimension_semantics=("parallel", "arbitrary"),
                vmem_limit_bytes=vmem_limit,
            ),
        )

    args = (params.scale, x_in, params.wf_p, params.wz_p)
    try:
        result = build_call(True)(*args)
    except Exception:
        # Fallback in case single-buffered pipeline_mode is unsupported.
        result = build_call(False)(*args)

    if return_features:
        logits_p, feats_p = result
        return logits_p[:B, :NC], feats_p[:B, :D]
    return result[:B, :NC]


def zero_shot_vlm_forward(x_nchw, w_feat, w_zs, logit_scale,
                          return_features=False, *, tb=None, tf=None):
    """Convenience one-shot wrapper (prep + apply).  Prefer preparing once."""
    params = prepare_zero_shot_vlm(w_feat, w_zs, logit_scale, tf=tf)
    return zero_shot_vlm_apply(params, x_nchw, return_features, tb=tb)


if __name__ == "__main__":
    # Small shapes consistent with the module's forward.
    B, C, H, W = 2, 4, 16, 16          # image batch, NCHW
    F = C * H * W                      # flattened feature-extractor input
    D = 64                             # embedding dim
    NUM_CLASSES = 10                   # len(metadata_map['y'])

    key = jax.random.PRNGKey(0)
    kx, kwf, kwz = jax.random.split(key, 3)

    x = jax.random.normal(kx, (B, C, H, W), dtype=jnp.float32)

    # Deterministic synthetic parameters.
    # TODO(synk): the reference featurizer / zeroshot_classifier are abstract
    # (NotImplementedError); a linear-proj + L2-norm featurizer and fixed
    # L2-normalized text embeddings stand in for the underlying VLM.
    w_feat = jax.random.normal(kwf, (F, D), dtype=jnp.float32) * 0.02
    w_zs = jax.random.normal(kwz, (D, NUM_CLASSES), dtype=jnp.float32)
    w_zs = w_zs / jnp.linalg.norm(w_zs, axis=0, keepdims=True)  # unit-norm text embeds

    logit_scale = jnp.float32(np.log(1.0 / 0.07))               # nn.Parameter init

    # Prepare (pad / cast) the static parameters exactly once.
    params = prepare_zero_shot_vlm(w_feat, w_zs, logit_scale)
    jax.block_until_ready(params.wf_p)

    # return_features=True path
    logits, feats = zero_shot_vlm_apply(params, x, return_features=True)
    # logits-only path (no feats HBM writeback)
    logits_only = zero_shot_vlm_apply(params, x, return_features=False)
    jax.block_until_ready((logits, feats, logits_only))

    # Plain-JAX reference of the same math (same bf16 operands, f32 accumulation).
    x_flat = x.reshape(B, F)
    ref_feats = jnp.dot(x_flat.astype(jnp.bfloat16), w_feat.astype(jnp.bfloat16),
                        preferred_element_type=jnp.float32)
    ref_feats = ref_feats * jax.lax.rsqrt(
        jnp.sum(ref_feats * ref_feats, axis=-1, keepdims=True) + 1e-12)
    ref_logits = jnp.dot(
        (ref_feats * jnp.exp(logit_scale)).astype(jnp.bfloat16),
        w_zs.astype(jnp.bfloat16),
        preferred_element_type=jnp.float32)

    assert logits.shape == (B, NUM_CLASSES)
    assert feats.shape == (B, D)
    assert logits_only.shape == (B, NUM_CLASSES)
    np.testing.assert_allclose(np.asarray(feats), np.asarray(ref_feats),
                               rtol=2e-3, atol=2e-3)
    np.testing.assert_allclose(np.asarray(logits), np.asarray(ref_logits),
                               rtol=1e-2, atol=1e-2)
    np.testing.assert_allclose(np.asarray(logits_only), np.asarray(logits),
                               rtol=1e-6, atol=1e-6)

    print("KERNEL_OK")
</pallas_src>

<mosaic_0001>
module attributes {stable_mosaic.version = 11 : i64} {
  func.func @kernel(%arg0: i32, %arg1: i32, %arg2: memref<1xf32, #tpu.memory_space<smem>>, %arg3: memref<8x1024xbf16, #tpu.memory_space<vmem>>, %arg4: memref<1024x128xbf16, #tpu.memory_space<vmem>>, %arg5: memref<128x128xbf16, #tpu.memory_space<vmem>>, %arg6: memref<8x128xf32, #tpu.memory_space<vmem>>, %arg7: memref<8x128xf32, #tpu.memory_space<vmem>>, %arg8: memref<8x128xf32, #tpu.memory_space<vmem>>) attributes {dimension_semantics = [#tpu.dimension_semantics<parallel>, #tpu.dimension_semantics<arbitrary>], iteration_bounds = array<i64: 1, 1>, scalar_prefetch = 0 : i64, scratch_operands = 1 : i64, tpu.core_type = #tpu.core_type<tc>, window_params = [{transform_indices = @transform_0, window_bounds = array<i64: 1>}, {transform_indices = @transform_1, window_bounds = array<i64: 8, 1024>}, {transform_indices = @transform_2, window_bounds = array<i64: 1024, 128>}, {pipeline_mode = #tpu.pipeline_mode<synchronous>, transform_indices = @transform_3, window_bounds = array<i64: 128, 128>}, {transform_indices = @transform_4, window_bounds = array<i64: 8, 128>}, {transform_indices = @transform_5, window_bounds = array<i64: 8, 128>}]} {
    %c0_i32 = arith.constant 0 : i32
    %0 = arith.cmpi eq, %arg1, %c0_i32 : i32
    %1 = arith.extui %0 : i1 to i32
    %c0_i32_0 = arith.constant 0 : i32
    %2 = arith.cmpi ne, %1, %c0_i32_0 : i32
    scf.if %2 {
      %cst_10 = arith.constant 0.000000e+00 : f32
      %12 = vector.broadcast %cst_10 : f32 to vector<8x128xf32>
      %c0_11 = arith.constant 0 : index
      %c0_12 = arith.constant 0 : index
      %13 = vector.load %arg8[%c0_11, %c0_12] : memref<8x128xf32, #tpu.memory_space<vmem>>, vector<8x128xf32>
      tpu.vector_store %arg8[%c0_11, %c0_12], %12 {strides = array<i32>} : memref<8x128xf32, #tpu.memory_space<vmem>>, vector<8x128xf32>,
    } else {
    }
    %c0 = arith.constant 0 : index
    %c0_1 = arith.constant 0 : index
    %3 = vector.load %arg8[%c0, %c0_1] : memref<8x128xf32, #tpu.memory_space<vmem>>, vector<8x128xf32>
    %c0_2 = arith.constant 0 : index
    %c0_3 = arith.constant 0 : index
    %4 = vector.load %arg3[%c0_2, %c0_3] : memref<8x1024xbf16, #tpu.memory_space<vmem>>, vector<8x1024xbf16>
    %c0_4 = arith.constant 0 : index
    %c0_5 = arith.constant 0 : index
    %5 = vector.load %arg4[%c0_4, %c0_5] : memref<1024x128xbf16, #tpu.memory_space<vmem>>, vector<1024x128xbf16>
    %cst = arith.constant dense<0.000000e+00> : vector<8x128xf32>
    %6 = tpu.matmul %4, %5, %cst {dimension_numbers = #tpu.dot_dimension_numbers<[1], [0], [0], [1], [0, 0, 1, 1], [], []>} : vector<8x1024xbf16>, vector<1024x128xbf16>, vector<8x128xf32> -> vector<8x128xf32>
    %7 = arith.addf %3, %6 : vector<8x128xf32>
    %c0_6 = arith.constant 0 : index
    %c0_7 = arith.constant 0 : index
    %8 = vector.load %arg8[%c0_6, %c0_7] : memref<8x128xf32, #tpu.memory_space<vmem>>, vector<8x128xf32>
    tpu.vector_store %arg8[%c0_6, %c0_7], %7 {strides = array<i32>} : memref<8x128xf32, #tpu.memory_space<vmem>>, vector<8x128xf32>,
    %c0_i32_8 = arith.constant 0 : i32
    %9 = arith.cmpi eq, %arg1, %c0_i32_8 : i32
    %10 = arith.extui %9 : i1 to i32
    %c0_i32_9 = arith.constant 0 : i32
    %11 = arith.cmpi ne, %10, %c0_i32_9 : i32
    scf.if %11 {
      %c0_10 = arith.constant 0 : index
      %c0_11 = arith.constant 0 : index
      %12 = vector.load %arg8[%c0_10, %c0_11] : memref<8x128xf32, #tpu.memory_space<vmem>>, vector<8x128xf32>
      %13 = arith.mulf %12, %12 : vector<8x128xf32>
      %cst_12 = arith.constant dense<0.000000e+00> : vector<8xf32>
      %14 = vector.multi_reduction <add>, %13, %cst_12 [1] : vector<8x128xf32> to vector<8xf32>
      %15 = vector.shape_cast %14 : vector<8xf32> to vector<8x1xf32>
      %cst_13 = arith.constant 9.99999996E-13 : f32
      %16 = vector.broadcast %cst_13 : f32 to vector<8x1xf32>
      %17 = arith.addf %15, %16 : vector<8x1xf32>
      %18 = math.rsqrt %17 : vector<8x1xf32>
      %19 = vector.broadcast %18 : vector<8x1xf32> to vector<8x128xf32>
      %20 = arith.mulf %12, %19 : vector<8x128xf32>
      %c0_14 = arith.constant 0 : index
      %c0_15 = arith.constant 0 : index
      %21 = vector.load %arg7[%c0_14, %c0_15] : memref<8x128xf32, #tpu.memory_space<vmem>>, vector<8x128xf32>
      tpu.vector_store %arg7[%c0_14, %c0_15], %20 {strides = array<i32>} : memref<8x128xf32, #tpu.memory_space<vmem>>, vector<8x128xf32>,
      %c0_16 = arith.constant 0 : index
      %22 = memref.load %arg2[%c0_16] : memref<1xf32, #tpu.memory_space<smem>>
      %23 = math.exp %22 : f32
      %24 = vector.broadcast %23 : f32 to vector<8x128xf32>
      %25 = arith.mulf %20, %24 : vector<8x128xf32>
      %26 = arith.truncf %25 : vector<8x128xf32> to vector<8x128xbf16>
      %c0_17 = arith.constant 0 : index
      %c0_18 = arith.constant 0 : index
      %27 = vector.load %arg5[%c0_17, %c0_18] : memref<128x128xbf16, #tpu.memory_space<vmem>>, vector<128x128xbf16>
      %cst_19 = arith.constant dense<0.000000e+00> : vector<8x128xf32>
      %28 = tpu.matmul %26, %27, %cst_19 {dimension_numbers = #tpu.dot_dimension_numbers<[1], [0], [0], [1], [0, 0, 1, 1], [], []>} : vector<8x128xbf16>, vector<128x128xbf16>, vector<8x128xf32> -> vector<8x128xf32>
      %c0_20 = arith.constant 0 : index
      %c0_21 = arith.constant 0 : index
      %29 = vector.load %arg6[%c0_20, %c0_21] : memref<8x128xf32, #tpu.memory_space<vmem>>, vector<8x128xf32>
      tpu.vector_store %arg6[%c0_20, %c0_21], %28 {strides = array<i32>} : memref<8x128xf32, #tpu.memory_space<vmem>>, vector<8x128xf32>,
    } else {
    }
    return
  }
  func.func @transform_0(%arg0: i32, %arg1: i32) -> i32 {
    %c0_i32 = arith.constant 0 : i32
    %c0_i32_0 = arith.constant 0 : i32
    return %c0_i32 : i32
  }
  func.func @transform_1(%arg0: i32, %arg1: i32) -> (i32, i32) {
    %c0_i32 = arith.constant 0 : i32
    return %arg0, %arg1 : i32, i32
  }
  func.func @transform_2(%arg0: i32, %arg1: i32) -> (i32, i32) {
    %c0_i32 = arith.constant 0 : i32
    %c0_i32_0 = arith.constant 0 : i32
    return %arg1, %c0_i32 : i32, i32
  }
  func.func @transform_3(%arg0: i32, %arg1: i32) -> (i32, i32) {
    %c0_i32 = arith.constant 0 : i32
    %c0_i32_0 = arith.constant 0 : i32
    %c0_i32_1 = arith.constant 0 : i32
    return %c0_i32, %c0_i32_0 : i32, i32
  }
  func.func @transform_4(%arg0: i32, %arg1: i32) -> (i32, i32) {
    %c0_i32 = arith.constant 0 : i32
    %c0_i32_0 = arith.constant 0 : i32
    return %arg0, %c0_i32 : i32, i32
  }
  func.func @transform_5(%arg0: i32, %arg1: i32) -> (i32, i32) {
    %c0_i32 = arith.constant 0 : i32
    %c0_i32_0 = arith.constant 0 : i32
    return %arg0, %c0_i32 : i32, i32
  }
}

module attributes {stable_mosaic.version = 11 : i64} {
  func.func @kernel(%arg0: i32, %arg1: i32, %arg2: memref<1xf32, #tpu.memory_space<smem>>, %arg3: memref<8x1024xbf16, #tpu.memory_space<vmem>>, %arg4: memref<1024x128xbf16, #tpu.memory_space<vmem>>, %arg5: memref<128x128xbf16, #tpu.memory_space<vmem>>, %arg6: memref<8x128xf32, #tpu.memory_space<vmem>>, %arg7: memref<8x128xf32, #tpu.memory_space<vmem>>, %arg8: memref<8x128xf32, #tpu.memory_space<vmem>>) attributes {dimension_semantics = [#tpu.dimension_semantics<parallel>, #tpu.dimension_semantics<arbitrary>], iteration_bounds = array<i64: 1, 1>, scalar_prefetch = 0 : i64, scratch_operands = 1 : i64, tpu.core_type = #tpu.core_type<tc>, window_params = [{transform_indices = @transform_0, window_bounds = array<i64: 1>}, {transform_indices = @transform_1, window_bounds = array<i64: 8, 1024>}, {transform_indices = @transform_2, window_bounds = array<i64: 1024, 128>}, {pipeline_mode = #tpu.pipeline_mode<synchronous>, transform_indices = @transform_3, window_bounds = array<i64: 128, 128>}, {transform_indices = @transform_4, window_bounds = array<i64: 8, 128>}, {transform_indices = @transform_5, window_bounds = array<i64: 8, 128>}]} {
    %c0_i32 = arith.constant 0 : i32
    %0 = arith.cmpi eq, %arg1, %c0_i32 : i32
    %1 = arith.extui %0 : i1 to i32
    %c0_i32_0 = arith.constant 0 : i32
    %2 = arith.cmpi ne, %1, %c0_i32_0 : i32
    scf.if %2 {
      %cst_10 = arith.constant 0.000000e+00 : f32
      %12 = vector.broadcast %cst_10 : f32 to vector<8x128xf32>
      %c0_11 = arith.constant 0 : index
      %c0_12 = arith.constant 0 : index
      %13 = vector.load %arg8[%c0_11, %c0_12] : memref<8x128xf32, #tpu.memory_space<vmem>>, vector<8x128xf32>
      tpu.vector_store %arg8[%c0_11, %c0_12], %12 {strides = array<i32>} : memref<8x128xf32, #tpu.memory_space<vmem>>, vector<8x128xf32>,
    } else {
    }
    %c0 = arith.constant 0 : index
    %c0_1 = arith.constant 0 : index
    %3 = vector.load %arg8[%c0, %c0_1] : memref<8x128xf32, #tpu.memory_space<vmem>>, vector<8x128xf32>
    %c0_2 = arith.constant 0 : index
    %c0_3 = arith.constant 0 : index
    %4 = vector.load %arg3[%c0_2, %c0_3] : memref<8x1024xbf16, #tpu.memory_space<vmem>>, vector<8x1024xbf16>
    %c0_4 = arith.constant 0 : index
    %c0_5 = arith.constant 0 : index
    %5 = vector.load %arg4[%c0_4, %c0_5] : memref<1024x128xbf16, #tpu.memory_space<vmem>>, vector<1024x128xbf16>
    %cst = arith.constant dense<0.000000e+00> : vector<8x128xf32>
    %6 = tpu.matmul %4, %5, %cst {dimension_numbers = #tpu.dot_dimension_numbers<[1], [0], [0], [1], [0, 0, 1, 1], [], []>} : vector<8x1024xbf16>, vector<1024x128xbf16>, vector<8x128xf32> -> vector<8x128xf32>
    %7 = arith.addf %3, %6 : vector<8x128xf32>
    %c0_6 = arith.constant 0 : index
    %c0_7 = arith.constant 0 : index
    %8 = vector.load %arg8[%c0_6, %c0_7] : memref<8x128xf32, #tpu.memory_space<vmem>>, vector<8x128xf32>
    tpu.vector_store %arg8[%c0_6, %c0_7], %7 {strides = array<i32>} : memref<8x128xf32, #tpu.memory_space<vmem>>, vector<8x128xf32>,
    %c0_i32_8 = arith.constant 0 : i32
    %9 = arith.cmpi eq, %arg1, %c0_i32_8 : i32
    %10 = arith.extui %9 : i1 to i32
    %c0_i32_9 = arith.constant 0 : i32
    %11 = arith.cmpi ne, %10, %c0_i32_9 : i32
    scf.if %11 {
      %c0_10 = arith.constant 0 : index
      %c0_11 = arith.constant 0 : index
      %12 = vector.load %arg8[%c0_10, %c0_11] : memref<8x128xf32, #tpu.memory_space<vmem>>, vector<8x128xf32>
      %13 = arith.mulf %12, %12 : vector<8x128xf32>
      %cst_12 = arith.constant dense<0.000000e+00> : vector<8xf32>
      %14 = vector.multi_reduction <add>, %13, %cst_12 [1] : vector<8x128xf32> to vector<8xf32>
      %15 = vector.shape_cast %14 : vector<8xf32> to vector<8x1xf32>
      %cst_13 = arith.constant 9.99999996E-13 : f32
      %16 = vector.broadcast %cst_13 : f32 to vector<8x1xf32>
      %17 = arith.addf %15, %16 : vector<8x1xf32>
      %18 = math.rsqrt %17 : vector<8x1xf32>
      %19 = vector.broadcast %18 : vector<8x1xf32> to vector<8x128xf32>
      %20 = arith.mulf %12, %19 : vector<8x128xf32>
      %c0_14 = arith.constant 0 : index
      %c0_15 = arith.constant 0 : index
      %21 = vector.load %arg7[%c0_14, %c0_15] : memref<8x128xf32, #tpu.memory_space<vmem>>, vector<8x128xf32>
      tpu.vector_store %arg7[%c0_14, %c0_15], %20 {strides = array<i32>} : memref<8x128xf32, #tpu.memory_space<vmem>>, vector<8x128xf32>,
      %c0_16 = arith.constant 0 : index
      %22 = memref.load %arg2[%c0_16] : memref<1xf32, #tpu.memory_space<smem>>
      %23 = math.exp %22 : f32
      %24 = vector.broadcast %23 : f32 to vector<8x128xf32>
      %25 = arith.mulf %20, %24 : vector<8x128xf32>
      %26 = arith.truncf %25 : vector<8x128xf32> to vector<8x128xbf16>
      %c0_17 = arith.constant 0 : index
      %c0_18 = arith.constant 0 : index
      %27 = vector.load %arg5[%c0_17, %c0_18] : memref<128x128xbf16, #tpu.memory_space<vmem>>, vector<128x128xbf16>
      %cst_19 = arith.constant dense<0.000000e+00> : vector<8x128xf32>
      %28 = tpu.matmul %26, %27, %cst_19 {dimension_numbers = #tpu.dot_dimension_numbers<[1], [0], [0], [1], [0, 0, 1, 1], [], []>} : vector<8x128xbf16>, vector<128x128xbf16>, vector<8x128xf32> -> vector<8x128xf32>
      %c0_20 = arith.constant 0 : index
      %c0_21 = arith.constant 0 : index
      %29 = vector.load %arg6[%c0_20, %c0_21] : memref<8x128xf32, #tpu.memory_space<vmem>>, vector<8x128xf32>
      tpu.vector_store %arg6[%c0_20, %c0_21], %28 {strides = array<i32>} : memref<8x128xf32, #tpu.memory_space<vmem>>, vector<8x128xf32>,
    } else {
    }
    return
  }
  func.func @transform_0(%arg0: i32, %arg1: i32) -> i32 {
    %c0_i32 = arith.constant 0 : i32
    %c0_i32_0 = arith.constant 0 : i32
    return %c0_i32 : i32
  }
  func.func @transform_1(%arg0: i32, %arg1: i32) -> (i32, i32) {
    %c0_i32 = arith.constant 0 : i32
    return %arg0, %arg1 : i32, i32
  }
  func.func @transform_2(%arg0: i32, %arg1: i32) -> (i32, i32) {
    %c0_i32 = arith.constant 0 : i32
    %c0_i32_0 = arith.constant 0 : i32
    return %arg1, %c0_i32 : i32, i32
  }
  func.func @transform_3(%arg0: i32, %arg1: i32) -> (i32, i32) {
    %c0_i32 = arith.constant 0 : i32
    %c0_i32_0 = arith.constant 0 : i32
    %c0_i32_1 = arith.constant 0 : i32
    return %c0_i32, %c0_i32_0 : i32, i32
  }
  func.func @transform_4(%arg0: i32, %arg1: i32) -> (i32, i32) {
    %c0_i32 = arith.constant 0 : i32
    %c0_i32_0 = arith.constant 0 : i32
    return %arg0, %c0_i32 : i32, i32
  }
  func.func @transform_5(%arg0: i32, %arg1: i32) -> (i32, i32) {
    %c0_i32 = arith.constant 0 : i32
    %c0_i32_0 = arith.constant 0 : i32
    return %arg0, %c0_i32 : i32, i32
  }
}

</mosaic_0001>

<bundles_post_ra>
// kernel: tpu_custom_call.1
= control target key start
LH: loop header
LB: loop body
LE: loop exit
PB: predicated region body
PF: predicated region fallthrough
CT: control target
= control target key end

     0   :  { %12 = vsyncpa [#allocation5], 0  ;;  %s1446_s0 = inlined_call_operand.<no memory space> [shape: f32[1], index: 0, kind: input, shape index: {}]   ;;  %s1447_s1 = inlined_call_operand.hbm [shape: bf16[8,1024], index: 1, kind: input, shape index: {}]   ;;  %s1448_s2 = inlined_call_operand.hbm [shape: bf16[1024,128], index: 2, kind: input, shape index: {}]   ;;  %s1449_s3 = inlined_call_operand.hbm [shape: bf16[128,128], index: 3, kind: input, shape index: {}]   ;;  %s1450_s4 = inlined_call_operand.hbm [shape: f32[8,128], index: 4, kind: output, shape index: {0}]   ;;  %s1451_s5 = inlined_call_operand.hbm [shape: f32[8,128], index: 5, kind: output, shape index: {1}]  }
   0x1   :  { %13 = vsyncpa [#allocation8], 0 }
   0x2   :  { %14 = vsyncpa [#allocation6], 0 }
   0x3   :  { %15 = vsyncpa [#allocation12], 0  ;;  %s1338_s18 = smov [#allocation7]   ;;  %s1220_s22 = scalar_lea.hbm %s1448_s2, 8192 }
   0x4   :  { %s33_s19 = sshll.u32 %s1338_s18, 4  ;;  %p1221_p0 = scmp.ne.s32.totalorder %s1448_s2, %s1220_s22  ;;  %s34_s19 = int_to_ptr.vmem [resolvable:$true] %s33_s19 }
   0x5   :  { %p1224_p1 = scmp.lt.u32.totalorder %s1220_s22, %s1448_s2 }
   0x7   :  { %p1226_p2 = pnand %p1224_p1, %p1221_p0 }
   0x9   :  { %1229 = shalt.err (!%p1226_p2)
}
   0xa   :  { %s1230_s27 = scalar_lea.vmem %s34_s19, 8192  ;;  %p1235_p4 = scmp.lt.s32.totalorder %s34_s19, %s34_s19 }
   0xb   :  { %p1231_p3 = scmp.ne.s32.totalorder %s34_s19, %s1230_s27  ;;  %p1236_p5 = scmp.lt.s32.totalorder %s1230_s27, %s1230_s27 }
   0xd   :  { %p1237_p6 = por %p1236_p5, %p1235_p4 }
   0xf   :  { %p1238_p7 = pnand %p1237_p6, %p1231_p3 }
  0x11   :  { %1241 = shalt.err (!%p1238_p7)
}
  0x12   :  { %s1339_s28 = smov 64   ;;  %s1340_s29 = smov 4  }
  0x13   :  { %39 = dma.hbm_to_vmem [thread:$0]  %s1448_s2, 8192, %s34_s19, [#allocation8], %s1339_s28, %s1339_s28, %s1340_s29  }
  0x14   :  { %s1341_s7 = smov [#allocation4]   ;;  %s1342_s9 = smov [#allocation9]  }
  0x15   :  { %s24_s8 = sshll.u32 %s1341_s7, 4  ;;  %s45_s10 = sshll.u32 %s1342_s9, 4  ;;  %s25_s8 = int_to_ptr.vmem [resolvable:$true] %s24_s8  ;;  %s46_s10 = int_to_ptr.vmem [resolvable:$true] %s45_s10 }
  0x16   :  { %s1242_s13 = scalar_lea.hbm %s1447_s1, 512 }
  0x17   :  { %p1243_p8 = scmp.ne.s32.totalorder %s1447_s1, %s1242_s13  ;;  %p1246_p9 = scmp.lt.u32.totalorder %s1242_s13, %s1447_s1 }
  0x19   :  { %p1248_p10 = pnand %p1246_p9, %p1243_p8 }
  0x1b   :  { %1251 = shalt.err (!%p1248_p10)
}
  0x1c   :  { %s1252_s2 = scalar_lea.vmem %s25_s8, 512  ;;  %p1257_p12 = scmp.lt.s32.totalorder %s25_s8, %s25_s8 }
  0x1d   :  { %p1253_p11 = scmp.ne.s32.totalorder %s25_s8, %s1252_s2  ;;  %p1258_p13 = scmp.lt.s32.totalorder %s1252_s2, %s1252_s2 }
  0x1f   :  { %p1259_p0 = por %p1258_p13, %p1257_p12 }
  0x21   :  { %p1260_p1 = pnand %p1259_p0, %p1253_p11 }
  0x23   :  { %1263 = shalt.err (!%p1260_p1)
}
  0x24   :  { %27 = dma.hbm_to_vmem [thread:$0]  %s1447_s1, 512, %s25_s8, [#allocation5]  }
  0x25   :  { %s1264_s22 = scalar_lea.hbm %s1449_s3, 1024 }
  0x26   :  { %p1265_p2 = scmp.ne.s32.totalorder %s1449_s3, %s1264_s22  ;;  %p1268_p3 = scmp.lt.u32.totalorder %s1264_s22, %s1449_s3 }
  0x28   :  { %p1270_p4 = pnand %p1268_p3, %p1265_p2 }
  0x2a   :  { %1273 = shalt.err (!%p1270_p4)
}
  0x2b   :  { %s1274_s27 = scalar_lea.vmem %s46_s10, 1024  ;;  %p1279_p6 = scmp.lt.s32.totalorder %s46_s10, %s46_s10 }
  0x2c   :  { %p1275_p5 = scmp.ne.s32.totalorder %s46_s10, %s1274_s27  ;;  %p1280_p7 = scmp.lt.s32.totalorder %s1274_s27, %s1274_s27 }
  0x2e   :  { %p1281_p8 = por %p1280_p7, %p1279_p6 }
  0x30   :  { %p1282_p9 = pnand %p1281_p8, %p1275_p5 }
  0x32   :  { %1285 = shalt.err (!%p1282_p9)
}
  0x33   :  { %51 = dma.hbm_to_vmem [thread:$0]  %s1449_s3, 1024, %s46_s10, [#allocation8], %s1339_s28, %s1339_s28, %s1340_s29  }
  0x34   :  { %1330 = dma.done.wait [#allocation5], 512  }
  0x35   :  { %1331 = vsyncadd [#allocation5], 4294966784 }
  0x36   :  { %1332 = dma.done.wait [#allocation8], 9216  }
  0x37   :  { %1333 = vsyncadd [#allocation8], 4294958080  ;;  %v1136_v0 = vld [vmem:[#allocation7 + $0x40] sm:$0xff]   ;;  %v1140_v4 = vld [vmem:[#allocation7 + $0x48] sm:$0xff]   ;;  %vm1344_vm0 = vmmov 0   ;;  %s1345_s29 = smov [#allocation11]  }
  0x38   :  { %v1137_v1 = vld [vmem:[#allocation7 + $0xc0] sm:$0xff]   ;;  %1008 = vmatprep.subr.bf16.mxu0 %v1136_v0  ;;  %v1141_v5 = vld [vmem:[#allocation7 + $0xc8] sm:$0xff]   ;;  %v1144_v8 = vld [vmem:[#allocation7 + $0x50] sm:$0xff]   ;;  %s914_s6 = sshll.u32 %s1345_s29, 4  ;;  %s915_s6 = int_to_ptr.vmem [resolvable:$true] %s914_s6 }
  0x39   :  { %v1138_v2 = vld [vmem:[#allocation7] sm:$0xff]   ;;  %1030 = vmatprep.subr.bf16.mxu1 %v1137_v1  ;;  %v1142_v6 = vld [vmem:[#allocation7 + $0x8] sm:$0xff]   ;;  %v1145_v9 = vld [vmem:[#allocation7 + $0xd0] sm:$0xff]   ;;  %s1286_s7 = scalar_lea.vmem %s915_s6, 128  ;;  %p1291_p11 = scmp.lt.s32.totalorder %s915_s6, %s915_s6 }
  0x3a   :  { %v1139_v3 = vld [vmem:[#allocation7 + $0x80] sm:$0xff]   ;;  %1009 = vmatpush3.bf16.msra.mxu0 %v1138_v2  ;;  %v1143_v7 = vld [vmem:[#allocation7 + $0x88] sm:$0xff]   ;;  %v1146_v10 = vld [vmem:[#allocation7 + $0x10] sm:$0xff]   ;;  %p1287_p10 = scmp.ne.s32.totalorder %s915_s6, %s1286_s7  ;;  %p1292_p12 = scmp.lt.s32.totalorder %s1286_s7, %s1286_s7 }
  0x3b   :  { %1031 = vmatpush3.bf16.msra.mxu1 %v1139_v3  ;;  %1010 = vmatprep.subr.bf16.mxu0 %v1140_v4  ;;  %v1147_v11 = vld [vmem:[#allocation7 + $0x90] sm:$0xff]   ;;  %v1148_v12 = vld [vmem:[#allocation7 + $0x58] sm:$0xff]   ;;  %v1152_v16 = vld [vmem:[#allocation7 + $0x60] sm:$0xff]  }
  0x3c   :  { %1032 = vmatprep.subr.bf16.mxu1 %v1141_v5  ;;  %v1149_v13 = vld [vmem:[#allocation7 + $0xd8] sm:$0xff]   ;;  %v1153_v17 = vld [vmem:[#allocation7 + $0xe0] sm:$0xff]   ;;  %v1156_v20 = vld [vmem:[#allocation7 + $0x68] sm:$0xff]   ;;  %p1293_p13 = por %p1292_p12, %p1291_p11 }
  0x3d   :  { %v1150_v14 = vld [vmem:[#allocation7 + $0x18] sm:$0xff]   ;;  %v1154_v18 = vld [vmem:[#allocation7 + $0x20] sm:$0xff]   ;;  %v1157_v21 = vld [vmem:[#allocation7 + $0xe8] sm:$0xff]  }
  0x3e   :  { %1011 = vmatpush3.bf16.msra.mxu0 %v1142_v6  ;;  %v1151_v15 = vld [vmem:[#allocation7 + $0x98] sm:$0xff]   ;;  %v1155_v19 = vld [vmem:[#allocation7 + $0xa0] sm:$0xff]   ;;  %v1158_v22 = vld [vmem:[#allocation7 + $0x28] sm:$0xff]   ;;  %p1294_p0 = pnand %p1293_p13, %p1287_p10 }
  0x3f   :  { %1033 = vmatpush3.bf16.msra.mxu1 %v1143_v7  ;;  %1012 = vmatprep.subr.bf16.mxu0 %v1144_v8  ;;  %v1159_v23 = vld [vmem:[#allocation7 + $0xa8] sm:$0xff]   ;;  %v1160_v24 = vld [vmem:[#allocation7 + $0x70] sm:$0xff]   ;;  %v1164_v28 = vld [vmem:[#allocation7 + $0x78] sm:$0xff]  }
  0x40   :  { %1034 = vmatprep.subr.bf16.mxu1 %v1145_v9  ;;  %v1161_v25 = vld [vmem:[#allocation7 + $0xf0] sm:$0xff]   ;;  %v1165_v29 = vld [vmem:[#allocation7 + $0xf8] sm:$0xff]   ;;  %v68_v32 = vld [vmem:[#allocation4] sm:$0xff] }
  0x41   :  { %v1162_v26 = vld [vmem:[#allocation7 + $0x30] sm:$0xff]   ;;  %v1166_v30 = vld [vmem:[#allocation7 + $0x38] sm:$0xff]   ;;  %v69_v33 = vld [vmem:[#allocation4 + $0x8] sm:$0xff]  ;;  %v928_v34 = vcombine.low %v68_v32, %v68_v32  ;;  %v929_v35 = vcombine.high %v68_v32, %v68_v32 }
  0x42   :  { %1013 = vmatpush3.bf16.msra.mxu0 %v1146_v10  ;;  %v1163_v27 = vld [vmem:[#allocation7 + $0xb0] sm:$0xff]   ;;  %v1167_v31 = vld [vmem:[#allocation7 + $0xb8] sm:$0xff]   ;;  %v930_v36 = vcombine.low %v69_v33, %v69_v33  ;;  %v931_v37 = vcombine.high %v69_v33, %v69_v33  ;;  %v1172_v38 = vld [vmem:[#allocation7 + $0x140] sm:$0xff]  }
  0x43   :  { %1035 = vmatpush3.bf16.msra.mxu1 %v1147_v11  ;;  %1014 = vmatprep.subr.bf16.mxu0 %v1148_v12  ;;  %v1173_v39 = vld [vmem:[#allocation7 + $0x1c0] sm:$0xff]   ;;  %v1176_v42 = vld [vmem:[#allocation7 + $0x148] sm:$0xff]   ;;  %v1180_v46 = vld [vmem:[#allocation7 + $0x150] sm:$0xff]   ;;  %v786_v12 = vstv %s1446_s0 }
  0x44   :  { %1036 = vmatprep.subr.bf16.mxu1 %v1149_v13  ;;  %644 = vmatprep.mubr.bf16.mxu0 %v929_v35  ;;  %v1174_v40 = vld [vmem:[#allocation7 + $0x100] sm:$0xff]   ;;  %v1177_v43 = vld [vmem:[#allocation7 + $0x1c8] sm:$0xff]   ;;  %v1181_v47 = vld [vmem:[#allocation7 + $0x1d0] sm:$0xff]  }
  0x45   :  { %684 = vmatprep.mubr.bf16.mxu1 %v931_v37  ;;  %v1175_v41 = vld [vmem:[#allocation7 + $0x180] sm:$0xff]   ;;  %v1178_v44 = vld [vmem:[#allocation7 + $0x108] sm:$0xff]   ;;  %v1182_v48 = vld [vmem:[#allocation7 + $0x110] sm:$0xff]  }
  0x46   :  { %1015 = vmatpush3.bf16.msra.mxu0 %v1150_v14  ;;  %v1179_v45 = vld [vmem:[#allocation7 + $0x188] sm:$0xff]   ;;  %v1183_v49 = vld [vmem:[#allocation7 + $0x190] sm:$0xff]   ;;  %v1184_v50 = vld [vmem:[#allocation7 + $0x158] sm:$0xff]   ;;  %v787_v14 = vmul.f32 1.442695, %v786_v12 }
  0x47   :  { %1037 = vmatpush3.bf16.msra.mxu1 %v1151_v15  ;;  %1016 = vmatprep.subr.bf16.mxu0 %v1152_v16  ;;  %v1185_v51 = vld [vmem:[#allocation7 + $0x1d8] sm:$0xff]   ;;  %v1188_v54 = vld [vmem:[#allocation7 + $0x160] sm:$0xff]   ;;  %v1192_v58 = vld [vmem:[#allocation7 + $0x168] sm:$0xff]   ;;  %v1343_v15 = vmov 0.0  }
  0x48   :  { %1038 = vmatprep.subr.bf16.mxu1 %v1153_v17  ;;  %v1186_v52 = vld [vmem:[#allocation7 + $0x118] sm:$0xff]   ;;  %v1189_v55 = vld [vmem:[#allocation7 + $0x1e0] sm:$0xff]   ;;  %v1193_v59 = vld [vmem:[#allocation7 + $0x1e8] sm:$0xff]   ;;  %1216 = vpow2.f32 %v787_v14 }
  0x49   :  { %v1187_v53 = vld [vmem:[#allocation7 + $0x198] sm:$0xff]   ;;  %v1190_v56 = vld [vmem:[#allocation7 + $0x120] sm:$0xff]   ;;  %v1194_v60 = vld [vmem:[#allocation7 + $0x128] sm:$0xff]  }
  0x4a   :  { %1017 = vmatpush3.bf16.msra.mxu0 %v1154_v18  ;;  %v1191_v57 = vld [vmem:[#allocation7 + $0x1a0] sm:$0xff]   ;;  %v1195_v61 = vld [vmem:[#allocation7 + $0x1a8] sm:$0xff]   ;;  %v1196_v62 = vld [vmem:[#allocation7 + $0x170] sm:$0xff]  }
  0x4b   :  { %1039 = vmatpush3.bf16.msra.mxu1 %v1155_v19  ;;  %1018 = vmatprep.subr.bf16.mxu0 %v1156_v20  ;;  %v1197_v63 = vld [vmem:[#allocation7 + $0x1f0] sm:$0xff]   ;;  %v1200_v2 = vld [vmem:[#allocation7 + $0x178] sm:$0xff]   ;;  %v1208_v13 = vld [vmem:[#allocation9] sm:$0xff]  }
  0x4c   :  { %1040 = vmatprep.subr.bf16.mxu1 %v1157_v21  ;;  %v1198_v0 = vld [vmem:[#allocation7 + $0x130] sm:$0xff]   ;;  %v1201_v3 = vld [vmem:[#allocation7 + $0x1f8] sm:$0xff]   ;;  %v1209_v16 = vld [vmem:[#allocation9 + $0x8] sm:$0xff]  }
  0x4d   :  { %v1199_v1 = vld [vmem:[#allocation7 + $0x1b0] sm:$0xff]   ;;  %v1202_v4 = vld [vmem:[#allocation7 + $0x138] sm:$0xff]  }
  0x4e   :  { %1019 = vmatpush3.bf16.msra.mxu0 %v1158_v22  ;;  %v1203_v5 = vld [vmem:[#allocation7 + $0x1b8] sm:$0xff]   ;;  %v70_v6 = vld [vmem:[#allocation4 + $0x10] sm:$0xff] }
  0x4f   :  { %1041 = vmatpush3.bf16.msra.mxu1 %v1159_v23  ;;  %1020 = vmatprep.subr.bf16.mxu0 %v1160_v24  ;;  %v932_v7 = vcombine.low %v70_v6, %v70_v6  ;;  %v933_v8 = vcombine.high %v70_v6, %v70_v6  ;;  %v71_v9 = vld [vmem:[#allocation4 + $0x18] sm:$0xff]  ;;  %v1210_v17 = vld [vmem:[#allocation9 + $0x10] sm:$0xff]  }
  0x50   :  { %1042 = vmatprep.subr.bf16.mxu1 %v1161_v25  ;;  %v934_v10 = vcombine.low %v71_v9, %v71_v9  ;;  %v935_v11 = vcombine.high %v71_v9, %v71_v9 }
  0x52   :  { %1021 = vmatpush3.bf16.msra.mxu0 %v1162_v26  ;;  %v1217_v18 = vpop.eup %1216 }
  0x53   :  { %1043 = vmatpush3.bf16.msra.mxu1 %v1163_v27  ;;  %1022 = vmatprep.subr.bf16.mxu0 %v1164_v28  ;;  %1125 = vpush %v1217_v18 }
  0x54   :  { %1044 = vmatprep.subr.bf16.mxu1 %v1165_v29 }
  0x56   :  { %1023 = vmatpush3.bf16.msra.mxu0 %v1166_v30 }
  0x57   :  { %1045 = vmatpush3.bf16.msra.mxu1 %v1167_v31  ;;  %1052 = vmatprep.subr.bf16.mxu0 %v1172_v38 }
  0x58   :  { %1074 = vmatprep.subr.bf16.mxu1 %v1173_v39 }
  0x59   :  { %645 = vmatmul.mubr.bf16.vlgmr.msra.gmra.mrb[0].mxu0 %v928_v34 }
  0x5a   :  { %685 = vmatmul.mubr.bf16.vlgmr.msra.gmra.mrb[0].mxu1 %v930_v36  ;;  %1053 = vmatpush3.bf16.msra.mxu0 %v1174_v40 }
  0x5b   :  { %1075 = vmatpush3.bf16.msra.mxu1 %v1175_v41  ;;  %1054 = vmatprep.subr.bf16.mxu0 %v1176_v42 }
  0x5c   :  { %1076 = vmatprep.subr.bf16.mxu1 %v1177_v43  ;;  %724 = vmatprep.mubr.bf16.mxu0 %v933_v8  ;;  %v1211_v43 = vld [vmem:[#allocation9 + $0x18] sm:$0xff]  }
  0x5d   :  { %764 = vmatprep.mubr.bf16.mxu1 %v935_v11 }
  0x5e   :  { %1055 = vmatpush3.bf16.msra.mxu0 %v1178_v44  ;;  %v1212_v44 = vld [vmem:[#allocation9 + $0x20] sm:$0xff]  }
  0x5f   :  { %1077 = vmatpush3.bf16.msra.mxu1 %v1179_v45  ;;  %1056 = vmatprep.subr.bf16.mxu0 %v1180_v46  ;;  %v1213_v45 = vld [vmem:[#allocation9 + $0x28] sm:$0xff]   ;;  %v1214_v46 = vld [vmem:[#allocation9 + $0x30] sm:$0xff]  }
  0x60   :  { %1078 = vmatprep.subr.bf16.mxu1 %v1181_v47  ;;  %v1215_v47 = vld [vmem:[#allocation9 + $0x38] sm:$0xff]  }
  0x62   :  { %1057 = vmatpush3.bf16.msra.mxu0 %v1182_v48 }
  0x63   :  { %1079 = vmatpush3.bf16.msra.mxu1 %v1183_v49  ;;  %1058 = vmatprep.subr.bf16.mxu0 %v1184_v50 }
  0x64   :  { %1080 = vmatprep.subr.bf16.mxu1 %v1185_v51 }
  0x66   :  { %1059 = vmatpush3.bf16.msra.mxu0 %v1186_v52 }
  0x67   :  { %1081 = vmatpush3.bf16.msra.mxu1 %v1187_v53  ;;  %1060 = vmatprep.subr.bf16.mxu0 %v1188_v54 }
  0x68   :  { %1082 = vmatprep.subr.bf16.mxu1 %v1189_v55 }
  0x6a   :  { %1061 = vmatpush3.bf16.msra.mxu0 %v1190_v56 }
  0x6b   :  { %1083 = vmatpush3.bf16.msra.mxu1 %v1191_v57  ;;  %1062 = vmatprep.subr.bf16.mxu0 %v1192_v58 }
  0x6c   :  { %1084 = vmatprep.subr.bf16.mxu1 %v1193_v59 }
  0x6e   :  { %1063 = vmatpush3.bf16.msra.mxu0 %v1194_v60 }
  0x6f   :  { %1085 = vmatpush3.bf16.msra.mxu1 %v1195_v61  ;;  %1064 = vmatprep.subr.bf16.mxu0 %v1196_v62 }
  0x70   :  { %1086 = vmatprep.subr.bf16.mxu1 %v1197_v63 }
  0x72   :  { %1065 = vmatpush3.bf16.msra.mxu0 %v1198_v0 }
  0x73   :  { %1087 = vmatpush3.bf16.msra.mxu1 %v1199_v1  ;;  %1066 = vmatprep.subr.bf16.mxu0 %v1200_v2 }
  0x74   :  { %1088 = vmatprep.subr.bf16.mxu1 %v1201_v3 }
  0x76   :  { %1067 = vmatpush3.bf16.msra.mxu0 %v1202_v4 }
  0x77   :  { %1089 = vmatpush3.bf16.msra.mxu1 %v1203_v5  ;;  %1105 = vmatprep.subr.bf16.mxu0 %v1343_v15 }
  0x79   :  { %725 = vmatmul.mubr.bf16.vlgmr.msra.gmra.mrb[4].mxu0 %v932_v7 }
  0x7a   :  { %765 = vmatmul.mubr.bf16.vlgmr.msra.gmra.mrb[4].mxu1 %v934_v10  ;;  %1106 = vmatpush3.bf16.msra.mxu0 %v1208_v13 }
  0x7b   :  { %1107 = vmatprep.subr.bf16.mxu0 %v1343_v15  ;;  %1121 = vmatprep.mubr.msk.bf16.mxu0 %vm1344_vm0, %v1343_v15 }
  0x7e   :  { %1108 = vmatpush3.bf16.msra.mxu0 %v1209_v16 }
  0x7f   :  { %1109 = vmatprep.subr.bf16.mxu0 %v1343_v15 }
  0x82   :  { %1110 = vmatpush3.bf16.msra.mxu0 %v1210_v17 }
  0x83   :  { %1111 = vmatprep.subr.bf16.mxu0 %v1343_v15 }
  0x84   :  { %s1126_s0 = spop %1125 }
  0x85   :  { %v790_v51 = vstv %s1126_s0 }
  0x86   :  { %1112 = vmatpush3.bf16.msra.mxu0 %v1211_v43 }
  0x87   :  { %1113 = vmatprep.subr.bf16.mxu0 %v1343_v15 }
  0x8a   :  { %1114 = vmatpush3.bf16.msra.mxu0 %v1212_v44 }
  0x8b   :  { %1115 = vmatprep.subr.bf16.mxu0 %v1343_v15 }
  0x8e   :  { %1116 = vmatpush3.bf16.msra.mxu0 %v1213_v45 }
  0x8f   :  { %1117 = vmatprep.subr.bf16.mxu0 %v1343_v15 }
  0x92   :  { %1118 = vmatpush3.bf16.msra.mxu0 %v1214_v46 }
  0x93   :  { %1119 = vmatprep.subr.bf16.mxu0 %v1343_v15 }
  0x96   :  { %1120 = vmatpush3.bf16.msra.mxu0 %v1215_v47 }
 0x12c   :  { %v1024_v19 = vpop.f32.mrb[0].mxu0 }
 0x12d   :  { %v1046_v20 = vpop.f32.mrb[0].mxu1  ;;  %v1025_v21 = vpop.f32.mrb[1].mxu0 }
 0x12e   :  { %v1047_v22 = vpop.f32.mrb[1].mxu1  ;;  %v1026_v23 = vadd.f32 %v1025_v21, %v1024_v19  ;;  %v1027_v25 = vpop.f32.mrb[2].mxu0 }
 0x12f   :  { %v1048_v24 = vadd.f32 %v1047_v22, %v1046_v20  ;;  %v1049_v26 = vpop.f32.mrb[2].mxu1  ;;  %v1028_v27 = vpop.f32.mrb[3].mxu0 }
 0x130   :  { %v1050_v28 = vpop.f32.mrb[3].mxu1 }
 0x131   :  { %v687_v29 = vadd.f32 %v1048_v24, %v1026_v23 }
 0x14c   :  { %v1068_v30 = vpop.f32.mrb[4].mxu0 }
 0x14d   :  { %v1090_v31 = vpop.f32.mrb[4].mxu1  ;;  %v1069_v32 = vpop.f32.mrb[5].mxu0 }
 0x14e   :  { %v1091_v33 = vpop.f32.mrb[5].mxu1  ;;  %v1070_v34 = vadd.f32 %v1069_v32, %v1068_v30  ;;  %v1071_v36 = vpop.f32.mrb[6].mxu0 }
 0x14f   :  { %v1092_v35 = vadd.f32 %v1091_v33, %v1090_v31  ;;  %v1093_v37 = vpop.f32.mrb[6].mxu1  ;;  %v1072_v38 = vpop.f32.mrb[7].mxu0 }
 0x150   :  { %v1094_v39 = vpop.f32.mrb[7].mxu1  ;;  %v727_v40 = vadd.f32 %v1070_v34, %v687_v29 }
 0x152   :  { %v767_v41 = vadd.f32 %v1092_v35, %v727_v40 }
 0x154   :  { %v778_v42 = vmul.f32 %v767_v41, %v767_v41 }
 0x156   :  { %779 = vadd.xlane.f32.xlu0 %v778_v42 }
 0x1e3   :  { %v780_v48 = vpop.xlane.xlu0 %779 }
 0x1e4   :  { %v781_v49 = vadd.f32 1e-12, %v780_v48 }
 0x1e6   :  { %1218 = vrsqrt.f32 %v781_v49 }
 0x1f0   :  { %v1219_v50 = vpop.eup %1218 }
 0x1f1   :  { %v783_v52 = vmul.f32 %v1219_v50, %v767_v41 }
 0x1f3   :  { %v791_v53 = vmul.f32 %v790_v51, %v783_v52  ;;  %784 = vst [vmem:[#allocation11] sm:$0xff] %v783_v52 }
 0x1f5   :  { %v792_v54 = vpack.c.bf16 %v791_v53, %v791_v53 }
 0x1f7   :  { %1122 = vmatmul.mubr.bf16.vlgmr.msra.gmra.mrb[8].mxu0 %v792_v54 }
 0x1f8   :  { %1297 = shalt.err (!%p1294_p0)
}
 0x1f9   :  { %s1298_s10 = scalar_lea.hbm %s1451_s5, 128 }
 0x1fa   :  { %p1299_p1 = scmp.ne.s32.totalorder %s1451_s5, %s1298_s10  ;;  %p1302_p2 = scmp.lt.u32.totalorder %s1298_s10, %s1451_s5 }
 0x1fc   :  { %p1304_p3 = pnand %p1302_p2, %p1299_p1 }
 0x1fe   :  { %1307 = shalt.err (!%p1304_p3)
}
 0x1ff   :  { %917 = dma.vmem_to_hbm [thread:$0]  %s915_s6, 128, %s1451_s5, [#allocation12]  }
 0x200   :  { %s1346_s17 = smov [#allocation10]  }
 0x201   :  { %s904_s2 = sshll.u32 %s1346_s17, 4  ;;  %s905_s2 = int_to_ptr.vmem [resolvable:$true] %s904_s2 }
 0x202   :  { %s1308_s18 = scalar_lea.vmem %s905_s2, 128  ;;  %p1313_p5 = scmp.lt.s32.totalorder %s905_s2, %s905_s2 }
 0x203   :  { %p1309_p4 = scmp.ne.s32.totalorder %s905_s2, %s1308_s18  ;;  %p1314_p6 = scmp.lt.s32.totalorder %s1308_s18, %s1308_s18 }
 0x205   :  { %p1315_p7 = por %p1314_p6, %p1313_p5 }
 0x207   :  { %p1316_p8 = pnand %p1315_p7, %p1309_p4 }
 0x2ca   :  { %v891_v55 = vpop.f32.mrb[8].mxu0 }
 0x2cb   :  { %897 = vst [vmem:[#allocation10] sm:$0xff] %v891_v55  ;;  %v1123_v56 = vpop.f32.mrb[9].mxu0 }
 0x2cc   :  { %v894_v57 = vpop.f32.mrb[10].mxu0 }
 0x2cd   :  { %1319 = shalt.err (!%p1316_p8)
}
 0x2ce   :  { %s1320_s21 = scalar_lea.hbm %s1450_s4, 128 }
 0x2cf   :  { %p1321_p9 = scmp.ne.s32.totalorder %s1450_s4, %s1320_s21  ;;  %p1324_p10 = scmp.lt.u32.totalorder %s1320_s21, %s1450_s4 }
 0x2d1   :  { %p1326_p11 = pnand %p1324_p10, %p1321_p9 }
 0x2d3   :  { %1329 = shalt.err (!%p1326_p11)
}
 0x2d4   :  { %907 = dma.vmem_to_hbm [thread:$0]  %s905_s2, 128, %s1450_s4, [#allocation6]   ;;  %v1124_v58 = vpop.f32.mrb[11].mxu0 }
 0x2d5   :  { %1334 = dma.done.wait [#allocation6], 128  }
 0x2d6   :  { %1335 = vsyncadd [#allocation6], 4294967168 }
 0x2d7   :  { %1336 = dma.done.wait [#allocation12], 128  }
 0x2d8   :  { %1337 = vsyncadd [#allocation12], 4294967168 }
 0x2d9   :  { %924 = vsyncpa [#allocation5], 1 }
 0x2da   :  { %925 = vsyncpa [#allocation8], 1 }
 0x2db   :  { %926 = vsyncpa [#allocation6], 1 }
 0x2dc   :  { %927 = vsyncpa [#allocation12], 1 }

// kernel: tpu_custom_call.1
= control target key start
LH: loop header
LB: loop body
LE: loop exit
PB: predicated region body
PF: predicated region fallthrough
CT: control target
= control target key end

     0   :  { %12 = vsyncpa [#allocation5], 0  ;;  %s1446_s0 = inlined_call_operand.<no memory space> [shape: f32[1], index: 0, kind: input, shape index: {}]   ;;  %s1447_s1 = inlined_call_operand.hbm [shape: bf16[8,1024], index: 1, kind: input, shape index: {}]   ;;  %s1448_s2 = inlined_call_operand.hbm [shape: bf16[1024,128], index: 2, kind: input, shape index: {}]   ;;  %s1449_s3 = inlined_call_operand.hbm [shape: bf16[128,128], index: 3, kind: input, shape index: {}]   ;;  %s1450_s4 = inlined_call_operand.hbm [shape: f32[8,128], index: 4, kind: output, shape index: {0}]   ;;  %s1451_s5 = inlined_call_operand.hbm [shape: f32[8,128], index: 5, kind: output, shape index: {1}]  }
   0x1   :  { %13 = vsyncpa [#allocation8], 0 }
   0x2   :  { %14 = vsyncpa [#allocation6], 0 }
   0x3   :  { %15 = vsyncpa [#allocation12], 0  ;;  %s1338_s18 = smov [#allocation7]   ;;  %s1220_s22 = scalar_lea.hbm %s1448_s2, 8192 }
   0x4   :  { %s33_s19 = sshll.u32 %s1338_s18, 4  ;;  %p1221_p0 = scmp.ne.s32.totalorder %s1448_s2, %s1220_s22  ;;  %s34_s19 = int_to_ptr.vmem [resolvable:$true] %s33_s19 }
   0x5   :  { %p1224_p1 = scmp.lt.u32.totalorder %s1220_s22, %s1448_s2 }
   0x7   :  { %p1226_p2 = pnand %p1224_p1, %p1221_p0 }
   0x9   :  { %1229 = shalt.err (!%p1226_p2)
}
   0xa   :  { %s1230_s27 = scalar_lea.vmem %s34_s19, 8192  ;;  %p1235_p4 = scmp.lt.s32.totalorder %s34_s19, %s34_s19 }
   0xb   :  { %p1231_p3 = scmp.ne.s32.totalorder %s34_s19, %s1230_s27  ;;  %p1236_p5 = scmp.lt.s32.totalorder %s1230_s27, %s1230_s27 }
   0xd   :  { %p1237_p6 = por %p1236_p5, %p1235_p4 }
   0xf   :  { %p1238_p7 = pnand %p1237_p6, %p1231_p3 }
  0x11   :  { %1241 = shalt.err (!%p1238_p7)
}
  0x12   :  { %s1339_s28 = smov 64   ;;  %s1340_s29 = smov 4  }
  0x13   :  { %39 = dma.hbm_to_vmem [thread:$0]  %s1448_s2, 8192, %s34_s19, [#allocation8], %s1339_s28, %s1339_s28, %s1340_s29  }
  0x14   :  { %s1341_s7 = smov [#allocation4]   ;;  %s1342_s9 = smov [#allocation9]  }
  0x15   :  { %s24_s8 = sshll.u32 %s1341_s7, 4  ;;  %s45_s10 = sshll.u32 %s1342_s9, 4  ;;  %s25_s8 = int_to_ptr.vmem [resolvable:$true] %s24_s8  ;;  %s46_s10 = int_to_ptr.vmem [resolvable:$true] %s45_s10 }
  0x16   :  { %s1242_s13 = scalar_lea.hbm %s1447_s1, 512 }
  0x17   :  { %p1243_p8 = scmp.ne.s32.totalorder %s1447_s1, %s1242_s13  ;;  %p1246_p9 = scmp.lt.u32.totalorder %s1242_s13, %s1447_s1 }
  0x19   :  { %p1248_p10 = pnand %p1246_p9, %p1243_p8 }
  0x1b   :  { %1251 = shalt.err (!%p1248_p10)
}
  0x1c   :  { %s1252_s2 = scalar_lea.vmem %s25_s8, 512  ;;  %p1257_p12 = scmp.lt.s32.totalorder %s25_s8, %s25_s8 }
  0x1d   :  { %p1253_p11 = scmp.ne.s32.totalorder %s25_s8, %s1252_s2  ;;  %p1258_p13 = scmp.lt.s32.totalorder %s1252_s2, %s1252_s2 }
  0x1f   :  { %p1259_p0 = por %p1258_p13, %p1257_p12 }
  0x21   :  { %p1260_p1 = pnand %p1259_p0, %p1253_p11 }
  0x23   :  { %1263 = shalt.err (!%p1260_p1)
}
  0x24   :  { %27 = dma.hbm_to_vmem [thread:$0]  %s1447_s1, 512, %s25_s8, [#allocation5]  }
  0x25   :  { %s1264_s22 = scalar_lea.hbm %s1449_s3, 1024 }
  0x26   :  { %p1265_p2 = scmp.ne.s32.totalorder %s1449_s3, %s1264_s22  ;;  %p1268_p3 = scmp.lt.u32.totalorder %s1264_s22, %s1449_s3 }
  0x28   :  { %p1270_p4 = pnand %p1268_p3, %p1265_p2 }
  0x2a   :  { %1273 = shalt.err (!%p1270_p4)
}
  0x2b   :  { %s1274_s27 = scalar_lea.vmem %s46_s10, 1024  ;;  %p1279_p6 = scmp.lt.s32.totalorder %s46_s10, %s46_s10 }
  0x2c   :  { %p1275_p5 = scmp.ne.s32.totalorder %s46_s10, %s1274_s27  ;;  %p1280_p7 = scmp.lt.s32.totalorder %s1274_s27, %s1274_s27 }
  0x2e   :  { %p1281_p8 = por %p1280_p7, %p1279_p6 }
  0x30   :  { %p1282_p9 = pnand %p1281_p8, %p1275_p5 }
  0x32   :  { %1285 = shalt.err (!%p1282_p9)
}
  0x33   :  { %51 = dma.hbm_to_vmem [thread:$0]  %s1449_s3, 1024, %s46_s10, [#allocation8], %s1339_s28, %s1339_s28, %s1340_s29  }
  0x34   :  { %1330 = dma.done.wait [#allocation5], 512  }
  0x35   :  { %1331 = vsyncadd [#allocation5], 4294966784 }
  0x36   :  { %1332 = dma.done.wait [#allocation8], 9216  }
  0x37   :  { %1333 = vsyncadd [#allocation8], 4294958080  ;;  %v1136_v0 = vld [vmem:[#allocation7 + $0x40] sm:$0xff]   ;;  %v1140_v4 = vld [vmem:[#allocation7 + $0x48] sm:$0xff]   ;;  %vm1344_vm0 = vmmov 0   ;;  %s1345_s29 = smov [#allocation11]  }
  0x38   :  { %v1137_v1 = vld [vmem:[#allocation7 + $0xc0] sm:$0xff]   ;;  %1008 = vmatprep.subr.bf16.mxu0 %v1136_v0  ;;  %v1141_v5 = vld [vmem:[#allocation7 + $0xc8] sm:$0xff]   ;;  %v1144_v8 = vld [vmem:[#allocation7 + $0x50] sm:$0xff]   ;;  %s914_s6 = sshll.u32 %s1345_s29, 4  ;;  %s915_s6 = int_to_ptr.vmem [resolvable:$true] %s914_s6 }
  0x39   :  { %v1138_v2 = vld [vmem:[#allocation7] sm:$0xff]   ;;  %1030 = vmatprep.subr.bf16.mxu1 %v1137_v1  ;;  %v1142_v6 = vld [vmem:[#allocation7 + $0x8] sm:$0xff]   ;;  %v1145_v9 = vld [vmem:[#allocation7 + $0xd0] sm:$0xff]   ;;  %s1286_s7 = scalar_lea.vmem %s915_s6, 128  ;;  %p1291_p11 = scmp.lt.s32.totalorder %s915_s6, %s915_s6 }
  0x3a   :  { %v1139_v3 = vld [vmem:[#allocation7 + $0x80] sm:$0xff]   ;;  %1009 = vmatpush3.bf16.msra.mxu0 %v1138_v2  ;;  %v1143_v7 = vld [vmem:[#allocation7 + $0x88] sm:$0xff]   ;;  %v1146_v10 = vld [vmem:[#allocation7 + $0x10] sm:$0xff]   ;;  %p1287_p10 = scmp.ne.s32.totalorder %s915_s6, %s1286_s7  ;;  %p1292_p12 = scmp.lt.s32.totalorder %s1286_s7, %s1286_s7 }
  0x3b   :  { %1031 = vmatpush3.bf16.msra.mxu1 %v1139_v3  ;;  %1010 = vmatprep.subr.bf16.mxu0 %v1140_v4  ;;  %v1147_v11 = vld [vmem:[#allocation7 + $0x90] sm:$0xff]   ;;  %v1148_v12 = vld [vmem:[#allocation7 + $0x58] sm:$0xff]   ;;  %v1152_v16 = vld [vmem:[#allocation7 + $0x60] sm:$0xff]  }
  0x3c   :  { %1032 = vmatprep.subr.bf16.mxu1 %v1141_v5  ;;  %v1149_v13 = vld [vmem:[#allocation7 + $0xd8] sm:$0xff]   ;;  %v1153_v17 = vld [vmem:[#allocation7 + $0xe0] sm:$0xff]   ;;  %v1156_v20 = vld [vmem:[#allocation7 + $0x68] sm:$0xff]   ;;  %p1293_p13 = por %p1292_p12, %p1291_p11 }
  0x3d   :  { %v1150_v14 = vld [vmem:[#allocation7 + $0x18] sm:$0xff]   ;;  %v1154_v18 = vld [vmem:[#allocation7 + $0x20] sm:$0xff]   ;;  %v1157_v21 = vld [vmem:[#allocation7 + $0xe8] sm:$0xff]  }
  0x3e   :  { %1011 = vmatpush3.bf16.msra.mxu0 %v1142_v6  ;;  %v1151_v15 = vld [vmem:[#allocation7 + $0x98] sm:$0xff]   ;;  %v1155_v19 = vld [vmem:[#allocation7 + $0xa0] sm:$0xff]   ;;  %v1158_v22 = vld [vmem:[#allocation7 + $0x28] sm:$0xff]   ;;  %p1294_p0 = pnand %p1293_p13, %p1287_p10 }
  0x3f   :  { %1033 = vmatpush3.bf16.msra.mxu1 %v1143_v7  ;;  %1012 = vmatprep.subr.bf16.mxu0 %v1144_v8  ;;  %v1159_v23 = vld [vmem:[#allocation7 + $0xa8] sm:$0xff]   ;;  %v1160_v24 = vld [vmem:[#allocation7 + $0x70] sm:$0xff]   ;;  %v1164_v28 = vld [vmem:[#allocation7 + $0x78] sm:$0xff]  }
  0x40   :  { %1034 = vmatprep.subr.bf16.mxu1 %v1145_v9  ;;  %v1161_v25 = vld [vmem:[#allocation7 + $0xf0] sm:$0xff]   ;;  %v1165_v29 = vld [vmem:[#allocation7 + $0xf8] sm:$0xff]   ;;  %v68_v32 = vld [vmem:[#allocation4] sm:$0xff] }
  0x41   :  { %v1162_v26 = vld [vmem:[#allocation7 + $0x30] sm:$0xff]   ;;  %v1166_v30 = vld [vmem:[#allocation7 + $0x38] sm:$0xff]   ;;  %v69_v33 = vld [vmem:[#allocation4 + $0x8] sm:$0xff]  ;;  %v928_v34 = vcombine.low %v68_v32, %v68_v32  ;;  %v929_v35 = vcombine.high %v68_v32, %v68_v32 }
  0x42   :  { %1013 = vmatpush3.bf16.msra.mxu0 %v1146_v10  ;;  %v1163_v27 = vld [vmem:[#allocation7 + $0xb0] sm:$0xff]   ;;  %v1167_v31 = vld [vmem:[#allocation7 + $0xb8] sm:$0xff]   ;;  %v930_v36 = vcombine.low %v69_v33, %v69_v33  ;;  %v931_v37 = vcombine.high %v69_v33, %v69_v33  ;;  %v1172_v38 = vld [vmem:[#allocation7 + $0x140] sm:$0xff]  }
  0x43   :  { %1035 = vmatpush3.bf16.msra.mxu1 %v1147_v11  ;;  %1014 = vmatprep.subr.bf16.mxu0 %v1148_v12  ;;  %v1173_v39 = vld [vmem:[#allocation7 + $0x1c0] sm:$0xff]   ;;  %v1176_v42 = vld [vmem:[#allocation7 + $0x148] sm:$0xff]   ;;  %v1180_v46 = vld [vmem:[#allocation7 + $0x150] sm:$0xff]   ;;  %v786_v12 = vstv %s1446_s0 }
  0x44   :  { %1036 = vmatprep.subr.bf16.mxu1 %v1149_v13  ;;  %644 = vmatprep.mubr.bf16.mxu0 %v929_v35  ;;  %v1174_v40 = vld [vmem:[#allocation7 + $0x100] sm:$0xff]   ;;  %v1177_v43 = vld [vmem:[#allocation7 + $0x1c8] sm:$0xff]   ;;  %v1181_v47 = vld [vmem:[#allocation7 + $0x1d0] sm:$0xff]  }
  0x45   :  { %684 = vmatprep.mubr.bf16.mxu1 %v931_v37  ;;  %v1175_v41 = vld [vmem:[#allocation7 + $0x180] sm:$0xff]   ;;  %v1178_v44 = vld [vmem:[#allocation7 + $0x108] sm:$0xff]   ;;  %v1182_v48 = vld [vmem:[#allocation7 + $0x110] sm:$0xff]  }
  0x46   :  { %1015 = vmatpush3.bf16.msra.mxu0 %v1150_v14  ;;  %v1179_v45 = vld [vmem:[#allocation7 + $0x188] sm:$0xff]   ;;  %v1183_v49 = vld [vmem:[#allocation7 + $0x190] sm:$0xff]   ;;  %v1184_v50 = vld [vmem:[#allocation7 + $0x158] sm:$0xff]   ;;  %v787_v14 = vmul.f32 1.442695, %v786_v12 }
  0x47   :  { %1037 = vmatpush3.bf16.msra.mxu1 %v1151_v15  ;;  %1016 = vmatprep.subr.bf16.mxu0 %v1152_v16  ;;  %v1185_v51 = vld [vmem:[#allocation7 + $0x1d8] sm:$0xff]   ;;  %v1188_v54 = vld [vmem:[#allocation7 + $0x160] sm:$0xff]   ;;  %v1192_v58 = vld [vmem:[#allocation7 + $0x168] sm:$0xff]   ;;  %v1343_v15 = vmov 0.0  }
  0x48   :  { %1038 = vmatprep.subr.bf16.mxu1 %v1153_v17  ;;  %v1186_v52 = vld [vmem:[#allocation7 + $0x118] sm:$0xff]   ;;  %v1189_v55 = vld [vmem:[#allocation7 + $0x1e0] sm:$0xff]   ;;  %v1193_v59 = vld [vmem:[#allocation7 + $0x1e8] sm:$0xff]   ;;  %1216 = vpow2.f32 %v787_v14 }
  0x49   :  { %v1187_v53 = vld [vmem:[#allocation7 + $0x198] sm:$0xff]   ;;  %v1190_v56 = vld [vmem:[#allocation7 + $0x120] sm:$0xff]   ;;  %v1194_v60 = vld [vmem:[#allocation7 + $0x128] sm:$0xff]  }
  0x4a   :  { %1017 = vmatpush3.bf16.msra.mxu0 %v1154_v18  ;;  %v1191_v57 = vld [vmem:[#allocation7 + $0x1a0] sm:$0xff]   ;;  %v1195_v61 = vld [vmem:[#allocation7 + $0x1a8] sm:$0xff]   ;;  %v1196_v62 = vld [vmem:[#allocation7 + $0x170] sm:$0xff]  }
  0x4b   :  { %1039 = vmatpush3.bf16.msra.mxu1 %v1155_v19  ;;  %1018 = vmatprep.subr.bf16.mxu0 %v1156_v20  ;;  %v1197_v63 = vld [vmem:[#allocation7 + $0x1f0] sm:$0xff]   ;;  %v1200_v2 = vld [vmem:[#allocation7 + $0x178] sm:$0xff]   ;;  %v1208_v13 = vld [vmem:[#allocation9] sm:$0xff]  }
  0x4c   :  { %1040 = vmatprep.subr.bf16.mxu1 %v1157_v21  ;;  %v1198_v0 = vld [vmem:[#allocation7 + $0x130] sm:$0xff]   ;;  %v1201_v3 = vld [vmem:[#allocation7 + $0x1f8] sm:$0xff]   ;;  %v1209_v16 = vld [vmem:[#allocation9 + $0x8] sm:$0xff]  }
  0x4d   :  { %v1199_v1 = vld [vmem:[#allocation7 + $0x1b0] sm:$0xff]   ;;  %v1202_v4 = vld [vmem:[#allocation7 + $0x138] sm:$0xff]  }
  0x4e   :  { %1019 = vmatpush3.bf16.msra.mxu0 %v1158_v22  ;;  %v1203_v5 = vld [vmem:[#allocation7 + $0x1b8] sm:$0xff]   ;;  %v70_v6 = vld [vmem:[#allocation4 + $0x10] sm:$0xff] }
  0x4f   :  { %1041 = vmatpush3.bf16.msra.mxu1 %v1159_v23  ;;  %1020 = vmatprep.subr.bf16.mxu0 %v1160_v24  ;;  %v932_v7 = vcombine.low %v70_v6, %v70_v6  ;;  %v933_v8 = vcombine.high %v70_v6, %v70_v6  ;;  %v71_v9 = vld [vmem:[#allocation4 + $0x18] sm:$0xff]  ;;  %v1210_v17 = vld [vmem:[#allocation9 + $0x10] sm:$0xff]  }
  0x50   :  { %1042 = vmatprep.subr.bf16.mxu1 %v1161_v25  ;;  %v934_v10 = vcombine.low %v71_v9, %v71_v9  ;;  %v935_v11 = vcombine.high %v71_v9, %v71_v9 }
  0x52   :  { %1021 = vmatpush3.bf16.msra.mxu0 %v1162_v26  ;;  %v1217_v18 = vpop.eup %1216 }
  0x53   :  { %1043 = vmatpush3.bf16.msra.mxu1 %v1163_v27  ;;  %1022 = vmatprep.subr.bf16.mxu0 %v1164_v28  ;;  %1125 = vpush %v1217_v18 }
  0x54   :  { %1044 = vmatprep.subr.bf16.mxu1 %v1165_v29 }
  0x56   :  { %1023 = vmatpush3.bf16.msra.mxu0 %v1166_v30 }
  0x57   :  { %1045 = vmatpush3.bf16.msra.mxu1 %v1167_v31  ;;  %1052 = vmatprep.subr.bf16.mxu0 %v1172_v38 }
  0x58   :  { %1074 = vmatprep.subr.bf16.mxu1 %v1173_v39 }
  0x59   :  { %645 = vmatmul.mubr.bf16.vlgmr.msra.gmra.mrb[0].mxu0 %v928_v34 }
  0x5a   :  { %685 = vmatmul.mubr.bf16.vlgmr.msra.gmra.mrb[0].mxu1 %v930_v36  ;;  %1053 = vmatpush3.bf16.msra.mxu0 %v1174_v40 }
  0x5b   :  { %1075 = vmatpush3.bf16.msra.mxu1 %v1175_v41  ;;  %1054 = vmatprep.subr.bf16.mxu0 %v1176_v42 }
  0x5c   :  { %1076 = vmatprep.subr.bf16.mxu1 %v1177_v43  ;;  %724 = vmatprep.mubr.bf16.mxu0 %v933_v8  ;;  %v1211_v43 = vld [vmem:[#allocation9 + $0x18] sm:$0xff]  }
  0x5d   :  { %764 = vmatprep.mubr.bf16.mxu1 %v935_v11 }
  0x5e   :  { %1055 = vmatpush3.bf16.msra.mxu0 %v1178_v44  ;;  %v1212_v44 = vld [vmem:[#allocation9 + $0x20] sm:$0xff]  }
  0x5f   :  { %1077 = vmatpush3.bf16.msra.mxu1 %v1179_v45  ;;  %1056 = vmatprep.subr.bf16.mxu0 %v1180_v46  ;;  %v1213_v45 = vld [vmem:[#allocation9 + $0x28] sm:$0xff]   ;;  %v1214_v46 = vld [vmem:[#allocation9 + $0x30] sm:$0xff]  }
  0x60   :  { %1078 = vmatprep.subr.bf16.mxu1 %v1181_v47  ;;  %v1215_v47 = vld [vmem:[#allocation9 + $0x38] sm:$0xff]  }
  0x62   :  { %1057 = vmatpush3.bf16.msra.mxu0 %v1182_v48 }
  0x63   :  { %1079 = vmatpush3.bf16.msra.mxu1 %v1183_v49  ;;  %1058 = vmatprep.subr.bf16.mxu0 %v1184_v50 }
  0x64   :  { %1080 = vmatprep.subr.bf16.mxu1 %v1185_v51 }
  0x66   :  { %1059 = vmatpush3.bf16.msra.mxu0 %v1186_v52 }
  0x67   :  { %1081 = vmatpush3.bf16.msra.mxu1 %v1187_v53  ;;  %1060 = vmatprep.subr.bf16.mxu0 %v1188_v54 }
  0x68   :  { %1082 = vmatprep.subr.bf16.mxu1 %v1189_v55 }
  0x6a   :  { %1061 = vmatpush3.bf16.msra.mxu0 %v1190_v56 }
  0x6b   :  { %1083 = vmatpush3.bf16.msra.mxu1 %v1191_v57  ;;  %1062 = vmatprep.subr.bf16.mxu0 %v1192_v58 }
  0x6c   :  { %1084 = vmatprep.subr.bf16.mxu1 %v1193_v59 }
  0x6e   :  { %1063 = vmatpush3.bf16.msra.mxu0 %v1194_v60 }
  0x6f   :  { %1085 = vmatpush3.bf16.msra.mxu1 %v1195_v61  ;;  %1064 = vmatprep.subr.bf16.mxu0 %v1196_v62 }
  0x70   :  { %1086 = vmatprep.subr.bf16.mxu1 %v1197_v63 }
  0x72   :  { %1065 = vmatpush3.bf16.msra.mxu0 %v1198_v0 }
  0x73   :  { %1087 = vmatpush3.bf16.msra.mxu1 %v1199_v1  ;;  %1066 = vmatprep.subr.bf16.mxu0 %v1200_v2 }
  0x74   :  { %1088 = vmatprep.subr.bf16.mxu1 %v1201_v3 }
  0x76   :  { %1067 = vmatpush3.bf16.msra.mxu0 %v1202_v4 }
  0x77   :  { %1089 = vmatpush3.bf16.msra.mxu1 %v1203_v5  ;;  %1105 = vmatprep.subr.bf16.mxu0 %v1343_v15 }
  0x79   :  { %725 = vmatmul.mubr.bf16.vlgmr.msra.gmra.mrb[4].mxu0 %v932_v7 }
  0x7a   :  { %765 = vmatmul.mubr.bf16.vlgmr.msra.gmra.mrb[4].mxu1 %v934_v10  ;;  %1106 = vmatpush3.bf16.msra.mxu0 %v1208_v13 }
  0x7b   :  { %1107 = vmatprep.subr.bf16.mxu0 %v1343_v15  ;;  %1121 = vmatprep.mubr.msk.bf16.mxu0 %vm1344_vm0, %v1343_v15 }
  0x7e   :  { %1108 = vmatpush3.bf16.msra.mxu0 %v1209_v16 }
  0x7f   :  { %1109 = vmatprep.subr.bf16.mxu0 %v1343_v15 }
  0x82   :  { %1110 = vmatpush3.bf16.msra.mxu0 %v1210_v17 }
  0x83   :  { %1111 = vmatprep.subr.bf16.mxu0 %v1343_v15 }
  0x84   :  { %s1126_s0 = spop %1125 }
  0x85   :  { %v790_v51 = vstv %s1126_s0 }
  0x86   :  { %1112 = vmatpush3.bf16.msra.mxu0 %v1211_v43 }
  0x87   :  { %1113 = vmatprep.subr.bf16.mxu0 %v1343_v15 }
  0x8a   :  { %1114 = vmatpush3.bf16.msra.mxu0 %v1212_v44 }
  0x8b   :  { %1115 = vmatprep.subr.bf16.mxu0 %v1343_v15 }
  0x8e   :  { %1116 = vmatpush3.bf16.msra.mxu0 %v1213_v45 }
  0x8f   :  { %1117 = vmatprep.subr.bf16.mxu0 %v1343_v15 }
  0x92   :  { %1118 = vmatpush3.bf16.msra.mxu0 %v1214_v46 }
  0x93   :  { %1119 = vmatprep.subr.bf16.mxu0 %v1343_v15 }
  0x96   :  { %1120 = vmatpush3.bf16.msra.mxu0 %v1215_v47 }
 0x12c   :  { %v1024_v19 = vpop.f32.mrb[0].mxu0 }
 0x12d   :  { %v1046_v20 = vpop.f32.mrb[0].mxu1  ;;  %v1025_v21 = vpop.f32.mrb[1].mxu0 }
 0x12e   :  { %v1047_v22 = vpop.f32.mrb[1].mxu1  ;;  %v1026_v23 = vadd.f32 %v1025_v21, %v1024_v19  ;;  %v1027_v25 = vpop.f32.mrb[2].mxu0 }
 0x12f   :  { %v1048_v24 = vadd.f32 %v1047_v22, %v1046_v20  ;;  %v1049_v26 = vpop.f32.mrb[2].mxu1  ;;  %v1028_v27 = vpop.f32.mrb[3].mxu0 }
 0x130   :  { %v1050_v28 = vpop.f32.mrb[3].mxu1 }
 0x131   :  { %v687_v29 = vadd.f32 %v1048_v24, %v1026_v23 }
 0x14c   :  { %v1068_v30 = vpop.f32.mrb[4].mxu0 }
 0x14d   :  { %v1090_v31 = vpop.f32.mrb[4].mxu1  ;;  %v1069_v32 = vpop.f32.mrb[5].mxu0 }
 0x14e   :  { %v1091_v33 = vpop.f32.mrb[5].mxu1  ;;  %v1070_v34 = vadd.f32 %v1069_v32, %v1068_v30  ;;  %v1071_v36 = vpop.f32.mrb[6].mxu0 }
 0x14f   :  { %v1092_v35 = vadd.f32 %v1091_v33, %v1090_v31  ;;  %v1093_v37 = vpop.f32.mrb[6].mxu1  ;;  %v1072_v38 = vpop.f32.mrb[7].mxu0 }
 0x150   :  { %v1094_v39 = vpop.f32.mrb[7].mxu1  ;;  %v727_v40 = vadd.f32 %v1070_v34, %v687_v29 }
 0x152   :  { %v767_v41 = vadd.f32 %v1092_v35, %v727_v40 }
 0x154   :  { %v778_v42 = vmul.f32 %v767_v41, %v767_v41 }
 0x156   :  { %779 = vadd.xlane.f32.xlu0 %v778_v42 }
 0x1e3   :  { %v780_v48 = vpop.xlane.xlu0 %779 }
 0x1e4   :  { %v781_v49 = vadd.f32 1e-12, %v780_v48 }
 0x1e6   :  { %1218 = vrsqrt.f32 %v781_v49 }
 0x1f0   :  { %v1219_v50 = vpop.eup %1218 }
 0x1f1   :  { %v783_v52 = vmul.f32 %v1219_v50, %v767_v41 }
 0x1f3   :  { %v791_v53 = vmul.f32 %v790_v51, %v783_v52  ;;  %784 = vst [vmem:[#allocation11] sm:$0xff] %v783_v52 }
 0x1f5   :  { %v792_v54 = vpack.c.bf16 %v791_v53, %v791_v53 }
 0x1f7   :  { %1122 = vmatmul.mubr.bf16.vlgmr.msra.gmra.mrb[8].mxu0 %v792_v54 }
 0x1f8   :  { %1297 = shalt.err (!%p1294_p0)
}
 0x1f9   :  { %s1298_s10 = scalar_lea.hbm %s1451_s5, 128 }
 0x1fa   :  { %p1299_p1 = scmp.ne.s32.totalorder %s1451_s5, %s1298_s10  ;;  %p1302_p2 = scmp.lt.u32.totalorder %s1298_s10, %s1451_s5 }
 0x1fc   :  { %p1304_p3 = pnand %p1302_p2, %p1299_p1 }
 0x1fe   :  { %1307 = shalt.err (!%p1304_p3)
}
 0x1ff   :  { %917 = dma.vmem_to_hbm [thread:$0]  %s915_s6, 128, %s1451_s5, [#allocation12]  }
 0x200   :  { %s1346_s17 = smov [#allocation10]  }
 0x201   :  { %s904_s2 = sshll.u32 %s1346_s17, 4  ;;  %s905_s2 = int_to_ptr.vmem [resolvable:$true] %s904_s2 }
 0x202   :  { %s1308_s18 = scalar_lea.vmem %s905_s2, 128  ;;  %p1313_p5 = scmp.lt.s32.totalorder %s905_s2, %s905_s2 }
 0x203   :  { %p1309_p4 = scmp.ne.s32.totalorder %s905_s2, %s1308_s18  ;;  %p1314_p6 = scmp.lt.s32.totalorder %s1308_s18, %s1308_s18 }
 0x205   :  { %p1315_p7 = por %p1314_p6, %p1313_p5 }
 0x207   :  { %p1316_p8 = pnand %p1315_p7, %p1309_p4 }
 0x2ca   :  { %v891_v55 = vpop.f32.mrb[8].mxu0 }
 0x2cb   :  { %897 = vst [vmem:[#allocation10] sm:$0xff] %v891_v55  ;;  %v1123_v56 = vpop.f32.mrb[9].mxu0 }
 0x2cc   :  { %v894_v57 = vpop.f32.mrb[10].mxu0 }
 0x2cd   :  { %1319 = shalt.err (!%p1316_p8)
}
 0x2ce   :  { %s1320_s21 = scalar_lea.hbm %s1450_s4, 128 }
 0x2cf   :  { %p1321_p9 = scmp.ne.s32.totalorder %s1450_s4, %s1320_s21  ;;  %p1324_p10 = scmp.lt.u32.totalorder %s1320_s21, %s1450_s4 }
 0x2d1   :  { %p1326_p11 = pnand %p1324_p10, %p1321_p9 }
 0x2d3   :  { %1329 = shalt.err (!%p1326_p11)
}
 0x2d4   :  { %907 = dma.vmem_to_hbm [thread:$0]  %s905_s2, 128, %s1450_s4, [#allocation6]   ;;  %v1124_v58 = vpop.f32.mrb[11].mxu0 }
 0x2d5   :  { %1334 = dma.done.wait [#allocation6], 128  }
 0x2d6   :  { %1335 = vsyncadd [#allocation6], 4294967168 }
 0x2d7   :  { %1336 = dma.done.wait [#allocation12], 128  }
 0x2d8   :  { %1337 = vsyncadd [#allocation12], 4294967168 }
 0x2d9   :  { %924 = vsyncpa [#allocation5], 1 }
 0x2da   :  { %925 = vsyncpa [#allocation8], 1 }
 0x2db   :  { %926 = vsyncpa [#allocation6], 1 }
 0x2dc   :  { %927 = vsyncpa [#allocation12], 1 }

</bundles_post_ra>
